<compile_context>
chip_gen: v7x
topology: tpu7x:2x2x1
jax: 0.10.0
libtpu: 0.0.40
codegen_flags: <defaults>
</compile_context>

<pallas_src>
import numpy as np
import jax
import jax.numpy as jnp
from jax.experimental import pallas as pl
from jax.experimental.pallas import tpu as pltpu

# ----------------------------- problem sizes ------------------------------
H = W = 32              # working resolution (stands in for the 256x256 resize)
CIN = 3                 # channels (input arrives as BGR)
STEM_C = 32             # synthetic stem width (b4 stem is 48; shrunk for demo)
NUM_CLASSES = 2
KH = KW = 3
STRIDE = 2
HO, WO = H // STRIDE, W // STRIDE
M = HO * WO             # stem-conv output positions per image (256)
K_RAW = KH * KW * CIN   # 27 flattened conv taps (reference only)
B = 2                   # demo batch size
B_PAD = 8               # output rows padded to a full sublane tile
CLS_PAD = 128           # output classes padded to a full lane tile


# ------------------------------ Pallas kernel ------------------------------
def _clf_kernel(x_ref, rsel_ref, a_ref, cb_ref, rpool_ref, fw_ref, fb_ref,
                probs_ref):
    # x: (B*H, W*CIN) bf16 raw BGR pixels.  /255, BGR->RGB, conv weights and the
    # conv zero-padding are folded into rsel (row im2col) and a (tap matrices).
    x = x_ref[...]

    # --- stem conv: 3 x (row-select matmul, tap matmul), accumulated in f32 ---
    feat = None
    for kh in range(KH):                       # static, fully unrolled
        rows = jnp.dot(rsel_ref[kh], x,        # (B*HO, W*CIN): exact selection
                       preferred_element_type=jnp.float32)
        rows = rows.astype(jnp.bfloat16)       # exact (selected bf16 values)
        tap = jnp.dot(rows, a_ref[kh],         # (B*HO, WO*STEM_C)
                      preferred_element_type=jnp.float32)
        feat = tap if feat is None else feat + tap
    feat = feat + cb_ref[...]                  # conv bias, tiled over WO

    # --- swish (SiLU) via a single EUP tanh: x*sigmoid(x) = 0.5x(1+tanh(x/2)) --
    feat = 0.5 * feat * (1.0 + jnp.tanh(0.5 * feat))

    # --- global average pool as an MXU matmul (block-diag pooling matrix) -----
    pooled = jnp.dot(rpool_ref[...], feat,     # (B_PAD, WO*STEM_C)
                     preferred_element_type=jnp.float32)

    # --- classifier head, classes padded to a full 128-lane tile --------------
    logits = jnp.dot(pooled, fw_ref[...],      # (B_PAD, CLS_PAD)
                     preferred_element_type=jnp.float32) + fb_ref[...]

    # --- softmax(dim=-1), exact division (padded classes get -1e30 -> 0) ------
    mx = jnp.max(logits, axis=-1, keepdims=True)
    e = jnp.exp(logits - mx)
    probs_ref[...] = e / jnp.sum(e, axis=-1, keepdims=True)


# ------------------------------ forward pass --------------------------------
@jax.jit
def predictor_image_forward(imgs, consts):
    """imgs: (B, H, W, 3) float32 raw BGR pixel values in [0, 255]."""
    rsel, a, cb_tiled, rpool, fw_big, fb_pad = consts
    # im2col / preprocessing live in the constants; the image enters the kernel
    # as a zero-copy reshape (bf16 cast halves the DMA bytes; integer pixels are
    # exact in bf16).
    x = imgs.reshape(B * H, W * CIN).astype(jnp.bfloat16)

    vmem = pl.BlockSpec(memory_space=pltpu.MemorySpace.VMEM)
    probs_pad = pl.pallas_call(
        _clf_kernel,
        in_specs=[vmem] * 7,
        out_specs=vmem,
        out_shape=jax.ShapeDtypeStruct((B_PAD, CLS_PAD), jnp.float32),
    )(x, rsel, a, cb_tiled, rpool, fw_big, fb_pad)

    probs = probs_pad[:B, :NUM_CLASSES]
    # argmax in the wrapper (softmax is monotone; first-index tie convention
    # matches torch.argmax on ties).
    pred = jnp.argmax(probs, axis=-1).astype(jnp.int32)
    return probs, pred


# --------------------------- deterministic params ---------------------------
def init_params(key):
    # TODO(synk): the pretrained 'weights/cls_invoice.pth' EfficientNet-b4
    # checkpoint cannot be loaded; weights are deterministic synthetic values in
    # "RGB tap order" like the PyTorch stem conv.
    kcw, kcb, kfw, kfb = jax.random.split(key, 4)
    cw_rgb = jax.random.normal(kcw, (K_RAW, STEM_C), jnp.float32) * 0.1
    # Choose weights whose /255-folded values are exactly bf16-representable so
    # the bf16 stem GEMM is (near) bit-accurate against the f32 reference.
    cw_rgb = (cw_rgb * (1.0 / 255.0)).astype(jnp.bfloat16).astype(jnp.float32) * 255.0
    cb = jax.random.normal(kcb, (1, STEM_C), jnp.float32) * 0.01
    fw = jax.random.normal(kfw, (STEM_C, NUM_CLASSES), jnp.float32) * 0.1
    fb = jax.random.normal(kfb, (1, NUM_CLASSES), jnp.float32) * 0.01
    return cw_rgb, cb, fw, fb


def build_kernel_constants(params):
    """One-time host-side fold: BGR->RGB flip, /255 scale, conv-tap weights,
    im2col row/column selection (incl. zero padding), GAP pooling and class
    padding are baked into small constant matrices so the kernel body is pure
    dense matmuls + elementwise ops."""
    cw_rgb, cb, fw, fb = (np.asarray(p, np.float32) for p in params)
    w = cw_rgb.reshape(KH, KW, CIN, STEM_C)            # RGB channel order
    w_bgr = w[:, :, ::-1, :] * (1.0 / 255.0)           # fold BGR->RGB + /255

    # Per-kh row-selection matrices (conv zero-pad rows handled by omission).
    rsel = np.zeros((KH, B * HO, B * H), np.float32)
    for kh in range(KH):
        for b in range(B):
            for ho in range(HO):
                r = 2 * ho + kh - 1
                if 0 <= r < H:
                    rsel[kh, b * HO + ho, b * H + r] = 1.0

    # Per-kh tap matrices: (image col, BGR channel) -> (output col, stem ch),
    # conv weights folded in; zero-pad columns handled by omission.
    a = np.zeros((KH, W * CIN, WO * STEM_C), np.float32)
    for kh in range(KH):
        for wo in range(WO):
            for kw in range(KW):
                col = 2 * wo + kw - 1
                if 0 <= col < W:
                    for ci in range(CIN):              # ci = input (BGR) channel
                        a[kh, col * CIN + ci,
                          wo * STEM_C:(wo + 1) * STEM_C] = w_bgr[kh, kw, ci, :]

    cb_tiled = np.tile(cb, (1, WO))                    # (1, WO*STEM_C)

    # Block-diagonal GAP matrix (rows >= B are zero -> padded output rows).
    rpool = np.zeros((B_PAD, B * HO), np.float32)
    for b in range(B):
        rpool[b, b * HO:(b + 1) * HO] = 1.0 / float(M)

    # FC head expanded over the (wo, c) feature layout, classes padded to 128.
    fw_big = np.zeros((WO * STEM_C, CLS_PAD), np.float32)
    fw_big[:, :NUM_CLASSES] = np.tile(fw, (WO, 1))
    fb_pad = np.full((1, CLS_PAD), -1e30, np.float32)  # padded classes -> prob 0
    fb_pad[0, :NUM_CLASSES] = fb[0]

    return (jnp.asarray(rsel, jnp.bfloat16),
            jnp.asarray(a, jnp.bfloat16),
            jnp.asarray(cb_tiled),
            jnp.asarray(rpool),
            jnp.asarray(fw_big),
            jnp.asarray(fb_pad))


# ------------------------------ pure-JAX reference --------------------------
def _im2col_single(img):
    """img: (H, W, CIN) -> (M, K_RAW) patch matrix for the 3x3/stride-2/pad-1 conv."""
    xp = jnp.pad(img, ((1, 1), (1, 1), (0, 0)))
    cols = [xp[kh:kh + STRIDE * HO:STRIDE, kw:kw + STRIDE * WO:STRIDE, :]
            for kh in range(KH) for kw in range(KW)]
    return jnp.concatenate(cols, axis=-1).reshape(M, K_RAW)


def _reference(imgs, params):
    cw_rgb, cb, fw, fb = params

    def one(img):
        rgb = img[..., ::-1] * (1.0 / 255.0)           # cv2 BGR->RGB + /255
        patches = _im2col_single(rgb)
        feat = patches @ cw_rgb + cb
        feat = feat * jax.nn.sigmoid(feat)             # swish / SiLU
        pooled = feat.mean(axis=0, keepdims=True)
        logits = pooled @ fw + fb
        probs = jax.nn.softmax(logits, axis=-1)
        pred = jnp.argmax(logits, axis=-1)
        return probs[0], pred[0].astype(jnp.int32)

    return jax.vmap(one)(imgs)


if __name__ == "__main__":
    key = jax.random.PRNGKey(0)
    k_img, k_w = jax.random.split(key)
    # TODO(synk): cv2.resize(..., (256, 256), INTER_AREA) has no Pallas
    # equivalent; inputs are assumed already at the working resolution.
    # Synthetic "images": integer-valued (uint8-like) BGR pixels in [0, 255].
    imgs = jax.random.randint(k_img, (B, H, W, CIN), 0, 256).astype(jnp.float32)

    params = init_params(k_w)
    consts = build_kernel_constants(params)            # free one-time fold

    probs, pred = predictor_image_forward(imgs, consts)
    jax.block_until_ready((probs, pred))

    ref_probs, ref_pred = _reference(imgs, params)
    assert jnp.allclose(probs, ref_probs, atol=2e-2), (probs, ref_probs)
    assert jnp.array_equal(pred, ref_pred), (pred, ref_pred)

    results = [int(p) for p in pred]                   # mirrors torch.argmax(...).item()
    assert all(r in (0, 1) for r in results)
    print("KERNEL_OK")
</pallas_src>

<mosaic_0001>
module attributes {stable_mosaic.version = 11 : i64} {
  func.func @_clf_kernel(%arg0: memref<64x96xbf16, #tpu.memory_space<vmem>>, %arg1: memref<3x32x64xbf16, #tpu.memory_space<vmem>>, %arg2: memref<3x96x512xbf16, #tpu.memory_space<vmem>>, %arg3: memref<1x512xf32, #tpu.memory_space<vmem>>, %arg4: memref<8x32xf32, #tpu.memory_space<vmem>>, %arg5: memref<512x128xf32, #tpu.memory_space<vmem>>, %arg6: memref<1x128xf32, #tpu.memory_space<vmem>>, %arg7: memref<8x128xf32, #tpu.memory_space<vmem>>) attributes {dimension_semantics = [], scalar_prefetch = 0 : i64, scratch_operands = 0 : i64, tpu.core_type = #tpu.core_type<tc>} {
    %c0 = arith.constant 0 : index
    %c0_0 = arith.constant 0 : index
    %0 = vector.load %arg0[%c0, %c0_0] : memref<64x96xbf16, #tpu.memory_space<vmem>>, vector<64x96xbf16>
    %c0_1 = arith.constant 0 : index
    %c0_2 = arith.constant 0 : index
    %c0_3 = arith.constant 0 : index
    %1 = vector.load %arg1[%c0_1, %c0_2, %c0_3] : memref<3x32x64xbf16, #tpu.memory_space<vmem>>, vector<1x32x64xbf16>
    %2 = vector.shape_cast %1 : vector<1x32x64xbf16> to vector<32x64xbf16>
    %cst = arith.constant dense<0.000000e+00> : vector<32x96xf32>
    %3 = tpu.matmul %2, %0, %cst {dimension_numbers = #tpu.dot_dimension_numbers<[1], [0], [0], [1], [0, 0, 1, 1], [], []>} : vector<32x64xbf16>, vector<64x96xbf16>, vector<32x96xf32> -> vector<32x96xf32>
    %4 = arith.truncf %3 : vector<32x96xf32> to vector<32x96xbf16>
    %c0_4 = arith.constant 0 : index
    %c0_5 = arith.constant 0 : index
    %c0_6 = arith.constant 0 : index
    %5 = vector.load %arg2[%c0_4, %c0_5, %c0_6] : memref<3x96x512xbf16, #tpu.memory_space<vmem>>, vector<1x96x512xbf16>
    %6 = vector.shape_cast %5 : vector<1x96x512xbf16> to vector<96x512xbf16>
    %cst_7 = arith.constant dense<0.000000e+00> : vector<32x512xf32>
    %7 = tpu.matmul %4, %6, %cst_7 {dimension_numbers = #tpu.dot_dimension_numbers<[1], [0], [0], [1], [0, 0, 1, 1], [], []>} : vector<32x96xbf16>, vector<96x512xbf16>, vector<32x512xf32> -> vector<32x512xf32>
    %c1 = arith.constant 1 : index
    %c0_8 = arith.constant 0 : index
    %c0_9 = arith.constant 0 : index
    %8 = vector.load %arg1[%c1, %c0_8, %c0_9] : memref<3x32x64xbf16, #tpu.memory_space<vmem>>, vector<1x32x64xbf16>
    %9 = vector.shape_cast %8 : vector<1x32x64xbf16> to vector<32x64xbf16>
    %cst_10 = arith.constant dense<0.000000e+00> : vector<32x96xf32>
    %10 = tpu.matmul %9, %0, %cst_10 {dimension_numbers = #tpu.dot_dimension_numbers<[1], [0], [0], [1], [0, 0, 1, 1], [], []>} : vector<32x64xbf16>, vector<64x96xbf16>, vector<32x96xf32> -> vector<32x96xf32>
    %11 = arith.truncf %10 : vector<32x96xf32> to vector<32x96xbf16>
    %c1_11 = arith.constant 1 : index
    %c0_12 = arith.constant 0 : index
    %c0_13 = arith.constant 0 : index
    %12 = vector.load %arg2[%c1_11, %c0_12, %c0_13] : memref<3x96x512xbf16, #tpu.memory_space<vmem>>, vector<1x96x512xbf16>
    %13 = vector.shape_cast %12 : vector<1x96x512xbf16> to vector<96x512xbf16>
    %cst_14 = arith.constant dense<0.000000e+00> : vector<32x512xf32>
    %14 = tpu.matmul %11, %13, %cst_14 {dimension_numbers = #tpu.dot_dimension_numbers<[1], [0], [0], [1], [0, 0, 1, 1], [], []>} : vector<32x96xbf16>, vector<96x512xbf16>, vector<32x512xf32> -> vector<32x512xf32>
    %15 = arith.addf %7, %14 : vector<32x512xf32>
    %c2 = arith.constant 2 : index
    %c0_15 = arith.constant 0 : index
    %c0_16 = arith.constant 0 : index
    %16 = vector.load %arg1[%c2, %c0_15, %c0_16] : memref<3x32x64xbf16, #tpu.memory_space<vmem>>, vector<1x32x64xbf16>
    %17 = vector.shape_cast %16 : vector<1x32x64xbf16> to vector<32x64xbf16>
    %cst_17 = arith.constant dense<0.000000e+00> : vector<32x96xf32>
    %18 = tpu.matmul %17, %0, %cst_17 {dimension_numbers = #tpu.dot_dimension_numbers<[1], [0], [0], [1], [0, 0, 1, 1], [], []>} : vector<32x64xbf16>, vector<64x96xbf16>, vector<32x96xf32> -> vector<32x96xf32>
    %19 = arith.truncf %18 : vector<32x96xf32> to vector<32x96xbf16>
    %c2_18 = arith.constant 2 : index
    %c0_19 = arith.constant 0 : index
    %c0_20 = arith.constant 0 : index
    %20 = vector.load %arg2[%c2_18, %c0_19, %c0_20] : memref<3x96x512xbf16, #tpu.memory_space<vmem>>, vector<1x96x512xbf16>
    %21 = vector.shape_cast %20 : vector<1x96x512xbf16> to vector<96x512xbf16>
    %cst_21 = arith.constant dense<0.000000e+00> : vector<32x512xf32>
    %22 = tpu.matmul %19, %21, %cst_21 {dimension_numbers = #tpu.dot_dimension_numbers<[1], [0], [0], [1], [0, 0, 1, 1], [], []>} : vector<32x96xbf16>, vector<96x512xbf16>, vector<32x512xf32> -> vector<32x512xf32>
    %23 = arith.addf %15, %22 : vector<32x512xf32>
    %c0_22 = arith.constant 0 : index
    %c0_23 = arith.constant 0 : index
    %24 = vector.load %arg3[%c0_22, %c0_23] : memref<1x512xf32, #tpu.memory_space<vmem>>, vector<1x512xf32>
    %25 = vector.broadcast %24 : vector<1x512xf32> to vector<32x512xf32>
    %26 = arith.addf %23, %25 : vector<32x512xf32>
    %cst_24 = arith.constant 5.000000e-01 : f32
    %27 = vector.broadcast %cst_24 : f32 to vector<32x512xf32>
    %28 = arith.mulf %27, %26 : vector<32x512xf32>
    %cst_25 = arith.constant 5.000000e-01 : f32
    %29 = vector.broadcast %cst_25 : f32 to vector<32x512xf32>
    %30 = arith.mulf %29, %26 : vector<32x512xf32>
    %31 = math.tanh %30 : vector<32x512xf32>
    %cst_26 = arith.constant 1.000000e+00 : f32
    %32 = vector.broadcast %cst_26 : f32 to vector<32x512xf32>
    %33 = arith.addf %32, %31 : vector<32x512xf32>
    %34 = arith.mulf %28, %33 : vector<32x512xf32>
    %c0_27 = arith.constant 0 : index
    %c0_28 = arith.constant 0 : index
    %35 = vector.load %arg4[%c0_27, %c0_28] : memref<8x32xf32, #tpu.memory_space<vmem>>, vector<8x32xf32>
    %cst_29 = arith.constant dense<0.000000e+00> : vector<8x512xf32>
    %36 = tpu.matmul %35, %34, %cst_29 {dimension_numbers = #tpu.dot_dimension_numbers<[1], [0], [0], [1], [0, 0, 1, 1], [], []>} : vector<8x32xf32>, vector<32x512xf32>, vector<8x512xf32> -> vector<8x512xf32>
    %c0_30 = arith.constant 0 : index
    %c0_31 = arith.constant 0 : index
    %37 = vector.load %arg5[%c0_30, %c0_31] : memref<512x128xf32, #tpu.memory_space<vmem>>, vector<512x128xf32>
    %cst_32 = arith.constant dense<0.000000e+00> : vector<8x128xf32>
    %38 = tpu.matmul %36, %37, %cst_32 {dimension_numbers = #tpu.dot_dimension_numbers<[1], [0], [0], [1], [0, 0, 1, 1], [], []>} : vector<8x512xf32>, vector<512x128xf32>, vector<8x128xf32> -> vector<8x128xf32>
    %c0_33 = arith.constant 0 : index
    %c0_34 = arith.constant 0 : index
    %39 = vector.load %arg6[%c0_33, %c0_34] : memref<1x128xf32, #tpu.memory_space<vmem>>, vector<1x128xf32>
    %40 = vector.broadcast %39 : vector<1x128xf32> to vector<8x128xf32>
    %41 = arith.addf %38, %40 : vector<8x128xf32>
    %cst_35 = arith.constant dense<0xFF800000> : vector<8xf32>
    %42 = vector.multi_reduction <maximumf>, %41, %cst_35 [1] : vector<8x128xf32> to vector<8xf32>
    %43 = vector.shape_cast %42 : vector<8xf32> to vector<8x1xf32>
    %44 = vector.broadcast %43 : vector<8x1xf32> to vector<8x128xf32>
    %45 = arith.subf %41, %44 : vector<8x128xf32>
    %46 = math.exp %45 : vector<8x128xf32>
    %cst_36 = arith.constant dense<0.000000e+00> : vector<8xf32>
    %47 = vector.multi_reduction <add>, %46, %cst_36 [1] : vector<8x128xf32> to vector<8xf32>
    %48 = vector.shape_cast %47 : vector<8xf32> to vector<8x1xf32>
    %49 = vector.broadcast %48 : vector<8x1xf32> to vector<8x128xf32>
    %50 = arith.divf %46, %49 : vector<8x128xf32>
    %c0_37 = arith.constant 0 : index
    %c0_38 = arith.constant 0 : index
    %51 = vector.load %arg7[%c0_37, %c0_38] : memref<8x128xf32, #tpu.memory_space<vmem>>, vector<8x128xf32>
    tpu.vector_store %arg7[%c0_37, %c0_38], %50 {strides = array<i32>} : memref<8x128xf32, #tpu.memory_space<vmem>>, vector<8x128xf32>,
    return
  }
}

</mosaic_0001>

<bundles_post_ra>
// kernel: predictor_image_forward.1
= control target key start
LH: loop header
LB: loop body
LE: loop exit
PB: predicated region body
PF: predicated region fallthrough
CT: control target
= control target key end

     0   :  { %12 = vsyncpa [#allocation3], 0  ;;  %s2129_s24 = smov [#allocation2]   ;;  %s2554_s0 = inlined_call_operand.vmem [shape: bf16[64,96], index: 0, kind: input, shape index: {}]   ;;  %s2555_s1 = inlined_call_operand.vmem [shape: bf16[3,32,64], index: 1, kind: input, shape index: {}]   ;;  %s2556_s2 = inlined_call_operand.vmem [shape: bf16[3,96,512], index: 2, kind: input, shape index: {}]   ;;  %s2557_s3 = inlined_call_operand.vmem [shape: f32[1,512], index: 3, kind: input, shape index: {}]   ;;  %s2558_s4 = inlined_call_operand.vmem [shape: f32[8,32], index: 4, kind: input, shape index: {}]   ;;  %s2559_s5 = inlined_call_operand.hbm [shape: f32[512,128], index: 5, kind: input, shape index: {}]   ;;  %s2560_s6 = inlined_call_operand.vmem [shape: f32[1,128], index: 6, kind: input, shape index: {}]   ;;  %s2561_s7 = inlined_call_operand.vmem [shape: f32[8,128], index: 7, kind: output, shape index: {}]  }
   0x1   :  { %s28_s25 = sshll.u32 %s2129_s24, 4  ;;  %s2105_s28 = scalar_lea.hbm %s2559_s5, 8192  ;;  %s29_s25 = int_to_ptr.vmem [resolvable:$true] %s28_s25 }
   0x2   :  { %p2106_p0 = scmp.ne.s32.totalorder %s2559_s5, %s2105_s28  ;;  %p2109_p1 = scmp.lt.u32.totalorder %s2105_s28, %s2559_s5 }
   0x4   :  { %p2111_p2 = pnand %p2109_p1, %p2106_p0 }
   0x6   :  { %2114 = shalt.err (!%p2111_p2)
}
   0x7   :  { %s2115_s10 = scalar_lea.vmem %s29_s25, 8192  ;;  %p2120_p4 = scmp.lt.s32.totalorder %s29_s25, %s29_s25 }
   0x8   :  { %p2116_p3 = scmp.ne.s32.totalorder %s29_s25, %s2115_s10  ;;  %p2121_p5 = scmp.lt.s32.totalorder %s2115_s10, %s2115_s10 }
   0xa   :  { %p2122_p6 = por %p2121_p5, %p2120_p4 }
   0xc   :  { %p2123_p7 = pnand %p2122_p6, %p2116_p3 }
   0xe   :  { %2126 = shalt.err (!%p2123_p7)
}
   0xf   :  { %s2130_s11 = smov 128   ;;  %s2131_s12 = smov 8  }
  0x10   :  { %34 = dma.hbm_to_vmem [thread:$0]  %s2559_s5, 8192, %s29_s25, [#allocation3], %s2130_s11, %s2130_s11, %s2131_s12  }
  0x11   :  { %2127 = dma.done.wait [#allocation3], 8192  }
  0x12   :  { %2128 = vsyncadd [#allocation3], 4294959104  ;;  %v2189_v0 = vld [vmem:[%s2554_s0] sm:$0xff]   ;;  %v2194_v1 = vld [vmem:[%s2554_s0 + $0x8] sm:$0xff]   ;;  %vm87_vm0 = vcmask 523264   ;;  %v2132_v34 = vmov 0  }
  0x13   :  { %1810 = vmatprep.subr.bf16.mxu1 %v2189_v0  ;;  %1798 = vmatprep.subr.bf16.mxu0 %v2189_v0  ;;  %v2202_v2 = vld [vmem:[%s2554_s0 + $0x10] sm:$0xff]   ;;  %v1957_v4 = vld [vmem:[%s2555_s1] sm:$0xff]   ;;  %v2220_v5 = vld [vmem:[%s2554_s0 + $0x18] sm:$0xff]   ;;  %vm386_vm1 = vcmask 785408   ;;  %vm1179_vm2 = vcmask 261120  }
  0x14   :  { %1811 = vmatpush3.bf16.msra.mxu1 %v2189_v0  ;;  %1799 = vmatpush3.bf16.msra.mxu0 %v2189_v0  ;;  %v1955_v3 = vld [vmem:[%s2555_s1 + $0x10] sm:$0xff]   ;;  %v1964_v7 = vld [vmem:[%s2556_s2 + $0xcc] ss:$16 sps:$4 sm:$0xff]   ;;  %v1962_v11 = vld [vmem:[%s2556_s2 + $0xc8] ss:$16 sps:$4 sm:$0xff]  }
  0x15   :  { %1812 = vmatprep.subr.bf16.mxu1 %v2194_v1  ;;  %1800 = vmatprep.subr.bf16.mxu0 %v2194_v1  ;;  %v1961_v6 = vld [vmem:[%s2556_s2 + $0xc4] ss:$16 sps:$4 sm:$0xff]   ;;  %v1956_v8 = vld [vmem:[%s2555_s1 + $0x18] sm:$0xff]   ;;  %v1958_v9 = vld [vmem:[%s2555_s1 + $0x8] sm:$0xff]  }
  0x16   :  { %1818 = vmatprep.mubr.msk.bf16.mxu1 %vm87_vm0, %v1955_v3  ;;  %1806 = vmatprep.mubr.msk.bf16.mxu0 %vm87_vm0, %v1957_v4  ;;  %v1959_v10 = vld [vmem:[%s2556_s2 + $0xc0] ss:$16 sps:$4 sm:$0xff]   ;;  %v1967_v12 = vld [vmem:[%s2556_s2 + $0xe4] ss:$16 sps:$4 sm:$0xff]   ;;  %v1970_v13 = vld [vmem:[%s2556_s2 + $0xec] ss:$16 sps:$4 sm:$0xff]  }
  0x17   :  { %v1965_v14 = vld [vmem:[%s2556_s2 + $0xe0] ss:$16 sps:$4 sm:$0xff]   ;;  %v1968_v15 = vld [vmem:[%s2556_s2 + $0xe8] ss:$16 sps:$4 sm:$0xff]   ;;  %v1973_v16 = vld [vmem:[%s2556_s2 + $0x104] ss:$16 sps:$4 sm:$0xff]  }
  0x18   :  { %1813 = vmatpush3.bf16.msra.mxu1 %v2194_v1  ;;  %1801 = vmatpush3.bf16.msra.mxu0 %v2194_v1  ;;  %v1976_v17 = vld [vmem:[%s2556_s2 + $0x10c] ss:$16 sps:$4 sm:$0xff]   ;;  %v1971_v18 = vld [vmem:[%s2556_s2 + $0x100] ss:$16 sps:$4 sm:$0xff]   ;;  %v1974_v19 = vld [vmem:[%s2556_s2 + $0x108] ss:$16 sps:$4 sm:$0xff]  }
  0x19   :  { %1814 = vmatprep.subr.bf16.mxu1 %v2202_v2  ;;  %1802 = vmatprep.subr.bf16.mxu0 %v2202_v2  ;;  %v1979_v20 = vld [vmem:[%s2556_s2 + $0x124] ss:$16 sps:$4 sm:$0xff]   ;;  %v1982_v21 = vld [vmem:[%s2556_s2 + $0x12c] ss:$16 sps:$4 sm:$0xff]   ;;  %v1977_v22 = vld [vmem:[%s2556_s2 + $0x120] ss:$16 sps:$4 sm:$0xff]  }
  0x1a   :  { %v1980_v23 = vld [vmem:[%s2556_s2 + $0x128] ss:$16 sps:$4 sm:$0xff]   ;;  %v1985_v24 = vld [vmem:[%s2556_s2 + $0x144] ss:$16 sps:$4 sm:$0xff]   ;;  %v1988_v25 = vld [vmem:[%s2556_s2 + $0x14c] ss:$16 sps:$4 sm:$0xff]  }
  0x1b   :  { %v1983_v26 = vld [vmem:[%s2556_s2 + $0x140] ss:$16 sps:$4 sm:$0xff]   ;;  %v1986_v27 = vld [vmem:[%s2556_s2 + $0x148] ss:$16 sps:$4 sm:$0xff]   ;;  %v1991_v28 = vld [vmem:[%s2556_s2 + $0x164] ss:$16 sps:$4 sm:$0xff]  }
  0x1c   :  { %1815 = vmatpush3.bf16.msra.mxu1 %v2202_v2  ;;  %1803 = vmatpush3.bf16.msra.mxu0 %v2202_v2  ;;  %v1994_v29 = vld [vmem:[%s2556_s2 + $0x16c] ss:$16 sps:$4 sm:$0xff]   ;;  %v1989_v30 = vld [vmem:[%s2556_s2 + $0x160] ss:$16 sps:$4 sm:$0xff]   ;;  %v1992_v31 = vld [vmem:[%s2556_s2 + $0x168] ss:$16 sps:$4 sm:$0xff]  }
  0x1d   :  { %1816 = vmatprep.subr.bf16.mxu1 %v2220_v5  ;;  %1804 = vmatprep.subr.bf16.mxu0 %v2220_v5  ;;  %v1997_v32 = vld [vmem:[%s2556_s2 + $0x4] ss:$16 sps:$4 sm:$0xff]   ;;  %v2000_v33 = vld [vmem:[%s2556_s2 + $0xc] ss:$16 sps:$4 sm:$0xff]   ;;  %v1995_v40 = vld [vmem:[%s2556_s2] ss:$16 sps:$4 sm:$0xff]  }
  0x1e   :  { %v1998_v44 = vld [vmem:[%s2556_s2 + $0x8] ss:$16 sps:$4 sm:$0xff]   ;;  %v2003_v48 = vld [vmem:[%s2556_s2 + $0x24] ss:$16 sps:$4 sm:$0xff]   ;;  %v2006_v49 = vld [vmem:[%s2556_s2 + $0x2c] ss:$16 sps:$4 sm:$0xff]  }
  0x1f   :  { %v2001_v51 = vld [vmem:[%s2556_s2 + $0x20] ss:$16 sps:$4 sm:$0xff]   ;;  %v2004_v52 = vld [vmem:[%s2556_s2 + $0x28] ss:$16 sps:$4 sm:$0xff]   ;;  %v2009_v53 = vld [vmem:[%s2556_s2 + $0x44] ss:$16 sps:$4 sm:$0xff]  }
  0x20   :  { %1817 = vmatpush3.bf16.msra.mxu1 %v2220_v5  ;;  %1805 = vmatpush3.bf16.msra.mxu0 %v2220_v5  ;;  %v2012_v54 = vld [vmem:[%s2556_s2 + $0x4c] ss:$16 sps:$4 sm:$0xff]   ;;  %v2007_v55 = vld [vmem:[%s2556_s2 + $0x40] ss:$16 sps:$4 sm:$0xff]   ;;  %v2010_v56 = vld [vmem:[%s2556_s2 + $0x48] ss:$16 sps:$4 sm:$0xff]  }
  0x21   :  { %393 = vmatprep.subr.bf16.mxu0 %v1961_v6  ;;  %446 = vmatprep.subr.bf16.mxu1 %v1964_v7  ;;  %v2015_v57 = vld [vmem:[%s2556_s2 + $0x64] ss:$16 sps:$4 sm:$0xff]   ;;  %v2018_v58 = vld [vmem:[%s2556_s2 + $0x6c] ss:$16 sps:$4 sm:$0xff]   ;;  %v2013_v59 = vld [vmem:[%s2556_s2 + $0x60] ss:$16 sps:$4 sm:$0xff]  }
  0x22   :  { %v2016_v60 = vld [vmem:[%s2556_s2 + $0x68] ss:$16 sps:$4 sm:$0xff]   ;;  %v2021_v61 = vld [vmem:[%s2556_s2 + $0x84] ss:$16 sps:$4 sm:$0xff]   ;;  %v2024_v62 = vld [vmem:[%s2556_s2 + $0x8c] ss:$16 sps:$4 sm:$0xff]  }
  0x23   :  { %1819 = vmatmul.mubr.msk.bf16.vlgmr.msra.gmra.mrb[0].mxu1 %vm87_vm0, %v1956_v8  ;;  %1807 = vmatmul.mubr.msk.bf16.vlgmr.msra.gmra.mrb[0].mxu0 %vm87_vm0, %v1958_v9  ;;  %v2019_v63 = vld [vmem:[%s2556_s2 + $0x80] ss:$16 sps:$4 sm:$0xff]   ;;  %v2022_v3 = vld [vmem:[%s2556_s2 + $0x88] ss:$16 sps:$4 sm:$0xff]   ;;  %v2027_v4 = vld [vmem:[%s2556_s2 + $0xa4] ss:$16 sps:$4 sm:$0xff]  }
  0x24   :  { %394 = vmatpush1.bf16.msra.mxu0 %v1959_v10  ;;  %447 = vmatpush1.bf16.msra.mxu1 %v1962_v11  ;;  %v2030_v6 = vld [vmem:[%s2556_s2 + $0xac] ss:$16 sps:$4 sm:$0xff]   ;;  %v2025_v7 = vld [vmem:[%s2556_s2 + $0xa0] ss:$16 sps:$4 sm:$0xff]   ;;  %v2028_v8 = vld [vmem:[%s2556_s2 + $0xa8] ss:$16 sps:$4 sm:$0xff]  }
  0x25   :  { %395 = vmatprep.subr.bf16.mxu0 %v1967_v12  ;;  %448 = vmatprep.subr.bf16.mxu1 %v1970_v13  ;;  %v2038_v9 = vld [vmem:[%s2556_s2 + $0x18c] ss:$16 sps:$4 sm:$0xff]   ;;  %v2036_v10 = vld [vmem:[%s2556_s2 + $0x188] ss:$16 sps:$4 sm:$0xff]   ;;  %v2031_v13 = vld [vmem:[%s2555_s1 + $0x20] sm:$0xff]  }
  0x26   :  { %425 = vmatprep.mubr.bf16.mxu0 %v2132_v34  ;;  %478 = vmatprep.mubr.bf16.mxu1 %v2132_v34  ;;  %v2044_v11 = vld [vmem:[%s2556_s2 + $0x1ac] ss:$16 sps:$4 sm:$0xff]   ;;  %v2042_v12 = vld [vmem:[%s2556_s2 + $0x1a8] ss:$16 sps:$4 sm:$0xff]  }
  0x28   :  { %396 = vmatpush1.bf16.msra.mxu0 %v1965_v14  ;;  %449 = vmatpush1.bf16.msra.mxu1 %v1968_v15  ;;  %v2048_v14 = vld [vmem:[%s2556_s2 + $0x1c8] ss:$16 sps:$4 sm:$0xff]   ;;  %v2035_v15 = vld [vmem:[%s2556_s2 + $0x184] ss:$16 sps:$4 sm:$0xff]  }
  0x29   :  { %397 = vmatprep.subr.bf16.mxu0 %v1973_v16  ;;  %450 = vmatprep.subr.bf16.mxu1 %v1976_v17  ;;  %v2054_v16 = vld [vmem:[%s2556_s2 + $0x1e8] ss:$16 sps:$4 sm:$0xff]   ;;  %v2062_v17 = vld [vmem:[%s2556_s2 + $0x20c] ss:$16 sps:$4 sm:$0xff]  }
  0x2c   :  { %398 = vmatpush1.bf16.msra.mxu0 %v1971_v18  ;;  %451 = vmatpush1.bf16.msra.mxu1 %v1974_v19  ;;  %v2033_v18 = vld [vmem:[%s2556_s2 + $0x180] ss:$16 sps:$4 sm:$0xff]   ;;  %v2041_v19 = vld [vmem:[%s2556_s2 + $0x1a4] ss:$16 sps:$4 sm:$0xff]  }
  0x2d   :  { %399 = vmatprep.subr.bf16.mxu0 %v1979_v20  ;;  %452 = vmatprep.subr.bf16.mxu1 %v1982_v21  ;;  %v2060_v20 = vld [vmem:[%s2556_s2 + $0x208] ss:$16 sps:$4 sm:$0xff]   ;;  %v2047_v21 = vld [vmem:[%s2556_s2 + $0x1c4] ss:$16 sps:$4 sm:$0xff]  }
  0x30   :  { %400 = vmatpush1.bf16.msra.mxu0 %v1977_v22  ;;  %453 = vmatpush1.bf16.msra.mxu1 %v1980_v23  ;;  %v2045_v22 = vld [vmem:[%s2556_s2 + $0x1c0] ss:$16 sps:$4 sm:$0xff]   ;;  %v2053_v23 = vld [vmem:[%s2556_s2 + $0x1e4] ss:$16 sps:$4 sm:$0xff]  }
  0x31   :  { %401 = vmatprep.subr.bf16.mxu0 %v1985_v24  ;;  %454 = vmatprep.subr.bf16.mxu1 %v1988_v25  ;;  %v2051_v24 = vld [vmem:[%s2556_s2 + $0x1e0] ss:$16 sps:$4 sm:$0xff]   ;;  %v2059_v25 = vld [vmem:[%s2556_s2 + $0x204] ss:$16 sps:$4 sm:$0xff]  }
  0x34   :  { %402 = vmatpush1.bf16.msra.mxu0 %v1983_v26  ;;  %455 = vmatpush1.bf16.msra.mxu1 %v1986_v27  ;;  %v2057_v26 = vld [vmem:[%s2556_s2 + $0x200] ss:$16 sps:$4 sm:$0xff]   ;;  %v2065_v27 = vld [vmem:[%s2556_s2 + $0x224] ss:$16 sps:$4 sm:$0xff]  }
  0x35   :  { %403 = vmatprep.subr.bf16.mxu0 %v1991_v28  ;;  %456 = vmatprep.subr.bf16.mxu1 %v1994_v29  ;;  %v2068_v28 = vld [vmem:[%s2556_s2 + $0x22c] ss:$16 sps:$4 sm:$0xff]   ;;  %v2063_v29 = vld [vmem:[%s2556_s2 + $0x220] ss:$16 sps:$4 sm:$0xff]  }
  0x38   :  { %404 = vmatpush1.bf16.msra.mxu0 %v1989_v30  ;;  %457 = vmatpush1.bf16.msra.mxu1 %v1992_v31  ;;  %v2066_v30 = vld [vmem:[%s2556_s2 + $0x228] ss:$16 sps:$4 sm:$0xff]  }
  0x39   :  { %625 = vmatprep.subr.bf16.mxu0 %v1997_v32  ;;  %678 = vmatprep.subr.bf16.mxu1 %v2000_v33 }
  0xf6   :  { %v1820_v35 = vpop.f32.mrb[0].mxu1  ;;  %v1808_v36 = vpop.f32.mrb[0].mxu0 }
  0xf7   :  { %v224_v37 = vpop.f32.mrb[1].mxu1  ;;  %v128_v38 = vpop.f32.mrb[1].mxu0 }
  0xf8   :  { %v1821_v39 = vpop.f32.mrb[2].mxu1  ;;  %v1809_v41 = vpop.f32.mrb[2].mxu0 }
  0xf9   :  { %v240_v42 = vpack.c.bf16 %v1821_v39, %v1820_v35  ;;  %v227_v43 = vpop.f32.mrb[3].mxu1  ;;  %v2324_v45 = vpack.c.bf16 %v1809_v41, %v1808_v36  ;;  %v131_v46 = vpop.f32.mrb[3].mxu0  ;;  %v1341_v39 = vld [vmem:[#allocation2 + $0x80] sm:$0xff] }
  0xfa   :  { %v239_v47 = vpack.c.bf16 %v227_v43, %v224_v37  ;;  %v143_v50 = vpack.c.bf16 %v131_v46, %v128_v38  ;;  %v2133_v38 = vmov 0.0   ;;  %v1325_v41 = vld [vmem:[#allocation2] sm:$0xff]  ;;  %v1326_v43 = vld [vmem:[#allocation2 + $0x8] sm:$0xff] }
  0xfb   :  { %v1852_v46 = vpack.c.bf16 %v1326_v43, %v1325_v41 }
  0xfc   :  { %1615 = vmatmul.mubr.msk.bf16.vlgmr.msra.gmra.mrb[4].mxu0 %vm386_vm1, %v239_v47  ;;  %1617 = vmatmul.mubr.msk.bf16.vlgmr.msra.gmra.mrb[4].mxu1 %vm386_vm1, %v239_v47 }
  0xfd   :  { %626 = vmatpush1.bf16.msra.mxu0 %v1995_v40  ;;  %679 = vmatpush1.bf16.msra.mxu1 %v1998_v44  ;;  %v1342_v40 = vld [vmem:[#allocation2 + $0x88] sm:$0xff]  ;;  %v1343_v44 = vld [vmem:[#allocation2 + $0x90] sm:$0xff] }
  0xfe   :  { %627 = vmatprep.subr.bf16.mxu0 %v2003_v48  ;;  %680 = vmatprep.subr.bf16.mxu1 %v2006_v49  ;;  %v1327_v48 = vld [vmem:[#allocation2 + $0x10] sm:$0xff]  ;;  %v1328_v49 = vld [vmem:[#allocation2 + $0x18] sm:$0xff] }
  0xff   :  { %435 = vmatprep.mubr.bf16.mxu0 %v2132_v34  ;;  %488 = vmatprep.mubr.bf16.mxu1 %v2132_v34 }
 0x101   :  { %628 = vmatpush1.bf16.msra.mxu0 %v2001_v51  ;;  %681 = vmatpush1.bf16.msra.mxu1 %v2004_v52  ;;  %v1346_v51 = vld [vmem:[#allocation2 + $0xa8] sm:$0xff] }
 0x102   :  { %629 = vmatprep.subr.bf16.mxu0 %v2009_v53  ;;  %682 = vmatprep.subr.bf16.mxu1 %v2012_v54  ;;  %v1329_v53 = vld [vmem:[#allocation2 + $0x20] sm:$0xff]  ;;  %v1330_v54 = vld [vmem:[#allocation2 + $0x28] sm:$0xff] }
 0x104   :  { %1616 = vmatmul.mubr.msk.bf16.gmra.mrb[8].mxu0 %vm386_vm1, %v240_v42  ;;  %1618 = vmatmul.mubr.msk.bf16.gmra.mrb[8].mxu1 %vm386_vm1, %v240_v42  ;;  %v1850_v42 = vpack.c.bf16 %v1342_v40, %v1341_v39 }
 0x105   :  { %630 = vmatpush1.bf16.msra.mxu0 %v2007_v55  ;;  %683 = vmatpush1.bf16.msra.mxu1 %v2010_v56  ;;  %v1347_v55 = vld [vmem:[#allocation2 + $0xb0] sm:$0xff]  ;;  %v1348_v56 = vld [vmem:[#allocation2 + $0xb8] sm:$0xff] }
 0x106   :  { %631 = vmatprep.subr.bf16.mxu0 %v2015_v57  ;;  %684 = vmatprep.subr.bf16.mxu1 %v2018_v58  ;;  %v1860_v57 = vpack.c.bf16 %v1330_v54, %v1329_v53  ;;  %v1862_v58 = vpack.c.bf16 %v1348_v56, %v1347_v55 }
 0x107   :  { %657 = vmatprep.mubr.bf16.mxu0 %v2132_v34  ;;  %710 = vmatprep.mubr.bf16.mxu1 %v2132_v34 }
 0x109   :  { %632 = vmatpush1.bf16.msra.mxu0 %v2013_v59  ;;  %685 = vmatpush1.bf16.msra.mxu1 %v2016_v60  ;;  %v1331_v59 = vld [vmem:[#allocation2 + $0x30] sm:$0xff]  ;;  %v1332_v60 = vld [vmem:[#allocation2 + $0x38] sm:$0xff] }
 0x10a   :  { %633 = vmatprep.subr.bf16.mxu0 %v2021_v61  ;;  %686 = vmatprep.subr.bf16.mxu1 %v2024_v62  ;;  %v1349_v61 = vld [vmem:[#allocation2 + $0xc0] sm:$0xff]  ;;  %v1350_v62 = vld [vmem:[#allocation2 + $0xc8] sm:$0xff] }
 0x10d   :  { %634 = vmatpush1.bf16.msra.mxu0 %v2019_v63  ;;  %687 = vmatpush1.bf16.msra.mxu1 %v2022_v3  ;;  %v1864_v63 = vpack.c.bf16 %v1332_v60, %v1331_v59  ;;  %v1866_v3 = vpack.c.bf16 %v1350_v62, %v1349_v61 }
 0x10e   :  { %635 = vmatprep.subr.bf16.mxu0 %v2027_v4  ;;  %688 = vmatprep.subr.bf16.mxu1 %v2030_v6  ;;  %v1333_v4 = vld [vmem:[#allocation2 + $0x40] sm:$0xff]  ;;  %v1334_v6 = vld [vmem:[#allocation2 + $0x48] sm:$0xff] }
 0x111   :  { %636 = vmatpush1.bf16.msra.mxu0 %v2025_v7  ;;  %689 = vmatpush1.bf16.msra.mxu1 %v2028_v8  ;;  %v1351_v7 = vld [vmem:[#allocation2 + $0xd0] sm:$0xff]  ;;  %v1352_v8 = vld [vmem:[#allocation2 + $0xd8] sm:$0xff] }
 0x112   :  { %1822 = vmatprep.subr.bf16.mxu0 %v2189_v0  ;;  %1007 = vmatprep.subr.bf16.mxu1 %v2038_v9  ;;  %v1868_v9 = vpack.c.bf16 %v1334_v6, %v1333_v4 }
 0x114   :  { %1643 = vmatmul.mubr.msk.bf16.vlgmr.msra.gmra.mrb[4].mxu0 %vm386_vm1, %v143_v50  ;;  %1645 = vmatmul.mubr.msk.bf16.vlgmr.msra.gmra.mrb[4].mxu1 %vm386_vm1, %v143_v50  ;;  %v1345_v50 = vld [vmem:[#allocation2 + $0xa0] sm:$0xff] }
 0x115   :  { %1823 = vmatpush3.bf16.msra.mxu0 %v2189_v0  ;;  %667 = vmatprep.mubr.bf16.mxu0 %v2132_v34  ;;  %v2050_v0 = vld [vmem:[%s2556_s2 + $0x1cc] ss:$16 sps:$4 sm:$0xff]   ;;  %v1858_v52 = vpack.c.bf16 %v1346_v51, %v1345_v50 }
 0x116   :  { %1824 = vmatprep.subr.bf16.mxu0 %v2194_v1  ;;  %720 = vmatprep.mubr.bf16.mxu1 %v2132_v34 }
 0x117   :  { %1008 = vmatpush1.bf16.msra.mxu1 %v2036_v10  ;;  %v1870_v10 = vpack.c.bf16 %v1352_v8, %v1351_v7 }
 0x118   :  { %1009 = vmatprep.subr.bf16.mxu1 %v2044_v11  ;;  %v1335_v11 = vld [vmem:[#allocation2 + $0x50] sm:$0xff] }
 0x119   :  { %1825 = vmatpush3.bf16.msra.mxu0 %v2194_v1  ;;  %v2056_v1 = vld [vmem:[%s2556_s2 + $0x1ec] ss:$16 sps:$4 sm:$0xff]  }
 0x11a   :  { %1826 = vmatprep.subr.bf16.mxu0 %v2202_v2 }
 0x11b   :  { %1010 = vmatpush1.bf16.msra.mxu1 %v2042_v12  ;;  %v1336_v12 = vld [vmem:[#allocation2 + $0x58] sm:$0xff] }
 0x11c   :  { %1644 = vmatmul.mubr.msk.bf16.gmra.mrb[8].mxu0 %vm386_vm1, %v2324_v45  ;;  %1646 = vmatmul.mubr.msk.bf16.gmra.mrb[8].mxu1 %vm386_vm1, %v2324_v45  ;;  %v1344_v45 = vld [vmem:[#allocation2 + $0x98] sm:$0xff] }
 0x11d   :  { %1827 = vmatpush3.bf16.msra.mxu0 %v2202_v2  ;;  %1830 = vmatprep.mubr.msk.bf16.mxu0 %vm87_vm0, %v2031_v13  ;;  %v2032_v2 = vld [vmem:[%s2555_s1 + $0x28] sm:$0xff]   ;;  %v1854_v47 = vpack.c.bf16 %v1344_v45, %v1343_v44  ;;  %v1353_v13 = vld [vmem:[#allocation2 + $0xe0] sm:$0xff] }
 0x11e   :  { %1828 = vmatprep.subr.bf16.mxu0 %v2220_v5  ;;  %1011 = vmatprep.subr.bf16.mxu1 %v2050_v0  ;;  %v1354_v0 = vld [vmem:[#allocation2 + $0xe8] sm:$0xff] }
 0x11f   :  { %1012 = vmatpush1.bf16.msra.mxu1 %v2048_v14  ;;  %1039 = vmatprep.mubr.bf16.mxu1 %v2132_v34  ;;  %v1872_v14 = vpack.c.bf16 %v1336_v12, %v1335_v11 }
 0x120   :  { %1013 = vmatprep.subr.bf16.mxu1 %v2056_v1  ;;  %v1874_v1 = vpack.c.bf16 %v1354_v0, %v1353_v13 }
 0x121   :  { %1829 = vmatpush3.bf16.msra.mxu0 %v2220_v5  ;;  %v2039_v5 = vld [vmem:[%s2556_s2 + $0x1a0] ss:$16 sps:$4 sm:$0xff]  }
 0x122   :  { %954 = vmatprep.subr.bf16.mxu0 %v2035_v15  ;;  %v1337_v15 = vld [vmem:[#allocation2 + $0x60] sm:$0xff] }
 0x123   :  { %1014 = vmatpush1.bf16.msra.mxu1 %v2054_v16  ;;  %v1338_v16 = vld [vmem:[#allocation2 + $0x68] sm:$0xff] }
 0x124   :  { %1831 = vmatmul.mubr.msk.bf16.vlgmr.msra.gmra.mrb[12].mxu0 %vm87_vm0, %v2032_v2  ;;  %1015 = vmatprep.subr.bf16.mxu1 %v2062_v17  ;;  %v1355_v2 = vld [vmem:[#allocation2 + $0xf0] sm:$0xff]  ;;  %v1356_v17 = vld [vmem:[#allocation2 + $0xf8] sm:$0xff] }
 0x125   :  { %955 = vmatpush1.bf16.msra.mxu0 %v2033_v18  ;;  %986 = vmatprep.mubr.bf16.mxu0 %v2132_v34  ;;  %v1876_v18 = vpack.c.bf16 %v1338_v16, %v1337_v15 }
 0x126   :  { %956 = vmatprep.subr.bf16.mxu0 %v2041_v19  ;;  %v1878_v19 = vpack.c.bf16 %v1356_v17, %v1355_v2 }
 0x127   :  { %1016 = vmatpush1.bf16.msra.mxu1 %v2060_v20  ;;  %v1078_v20 = vlaneseq }
 0x128   :  { %1017 = vmatprep.subr.bf16.mxu1 %v2068_v28 }
 0x129   :  { %957 = vmatpush1.bf16.msra.mxu0 %v2039_v5  ;;  %v1079_v5 = vshrl.u32 %v1078_v20, 7 }
 0x12a   :  { %958 = vmatprep.subr.bf16.mxu0 %v2047_v21 }
 0x12b   :  { %1018 = vmatpush1.bf16.msra.mxu1 %v2066_v30  ;;  %v1080_v21 = vsub.s32 0, %v1079_v5 }
 0x12d   :  { %959 = vmatpush1.bf16.msra.mxu0 %v2045_v22  ;;  %v1088_v22 = vsub.s32 2, %v1079_v5 }
 0x12e   :  { %960 = vmatprep.subr.bf16.mxu0 %v2053_v23  ;;  %v1076_v23 = vld [vmem:[%s2557_s3] sm:$0xf] }
 0x131   :  { %961 = vmatpush1.bf16.msra.mxu0 %v2051_v24  ;;  %v1084_v24 = vsub.s32 1, %v1079_v5 }
 0x132   :  { %962 = vmatprep.subr.bf16.mxu0 %v2059_v25  ;;  %v1092_v25 = vsub.s32 3, %v1079_v5 }
 0x133   :  { %v1085_v28 = vrot.slane %v1076_v23, %v1084_v24 }
 0x135   :  { %963 = vmatpush1.bf16.msra.mxu0 %v2057_v26  ;;  %v1081_v26 = vrot.slane %v1076_v23, %v1080_v21 }
 0x136   :  { %964 = vmatprep.subr.bf16.mxu0 %v2065_v27  ;;  %v1089_v27 = vrot.slane %v1076_v23, %v1088_v22 }
 0x139   :  { %965 = vmatpush1.bf16.msra.mxu0 %v2063_v29  ;;  %v1093_v29 = vrot.slane %v1076_v23, %v1092_v25 }
 0x13a   :  { %1851 = vmatprep.subr.bf16.mxu0 %v1850_v42 }
 0x1f7   :  { %v1832_v31 = vpop.f32.mrb[12].mxu0 }
 0x1f8   :  { %v786_v32 = vpop.f32.mrb[13].mxu0 }
 0x1f9   :  { %v1833_v33 = vpop.f32.mrb[14].mxu0 }
 0x1fa   :  { %v802_v35 = vpack.c.bf16 %v1833_v33, %v1832_v31  ;;  %v789_v36 = vpop.f32.mrb[15].mxu0 }
 0x1fb   :  { %v801_v37 = vpack.c.bf16 %v789_v36, %v786_v32 }
 0x1fd   :  { %1703 = vmatmul.mubr.msk.bf16.vlgmr.msra.gmra.mrb[4].mxu0 %vm386_vm1, %v801_v37  ;;  %1705 = vmatmul.mubr.msk.bf16.vlgmr.msra.gmra.mrb[4].mxu1 %vm386_vm1, %v801_v37 }
 0x1fe   :  { %996 = vmatprep.mubr.bf16.mxu0 %v2132_v34  ;;  %1049 = vmatprep.mubr.bf16.mxu1 %v2132_v34  ;;  %v1856_v34 = vpack.c.bf16 %v1328_v49, %v1327_v48 }
 0x1ff   :  { %1853 = vmatpush3.bf16.msra.mxu0 %v1852_v46 }
 0x200   :  { %1855 = vmatprep.subr.bf16.mxu0 %v1854_v47 }
 0x203   :  { %1857 = vmatpush3.bf16.msra.mxu0 %v1856_v34 }
 0x204   :  { %1859 = vmatprep.subr.bf16.mxu0 %v1858_v52 }
 0x205   :  { %1704 = vmatmul.mubr.msk.bf16.gmra.mrb[8].mxu0 %vm386_vm1, %v802_v35  ;;  %1706 = vmatmul.mubr.msk.bf16.gmra.mrb[8].mxu1 %vm386_vm1, %v802_v35 }
 0x206   :  { %1247 = vmatprep.mubr.f32.mxu1 %v2133_v38 }
 0x207   :  { %1861 = vmatpush3.bf16.msra.mxu0 %v1860_v57 }
 0x208   :  { %1863 = vmatprep.subr.bf16.mxu0 %v1862_v58 }
 0x20b   :  { %1865 = vmatpush3.bf16.msra.mxu0 %v1864_v63 }
 0x20c   :  { %1867 = vmatprep.subr.bf16.mxu0 %v1866_v3 }
 0x20f   :  { %1869 = vmatpush3.bf16.msra.mxu0 %v1868_v9 }
 0x210   :  { %1871 = vmatprep.subr.bf16.mxu0 %v1870_v10 }
 0x213   :  { %1873 = vmatpush3.bf16.msra.mxu0 %v1872_v14 }
 0x214   :  { %1875 = vmatprep.subr.bf16.mxu0 %v1874_v1 }
 0x217   :  { %1877 = vmatpush3.bf16.msra.mxu0 %v1876_v18 }
 0x218   :  { %1879 = vmatprep.subr.bf16.mxu0 %v1878_v19 }
 0x2d0   :  { %v988_v30 = vpop.f32.mrb[4].mxu0  ;;  %v1041_v31 = vpop.f32.mrb[4].mxu1 }
 0x2d1   :  { %v1098_v32 = vadd.f32 %v1081_v26, %v988_v30  ;;  %v1100_v33 = vadd.f32 %v1089_v27, %v1041_v31  ;;  %v990_v35 = vpop.f32.mrb[5].mxu0  ;;  %v1043_v36 = vpop.f32.mrb[5].mxu1 }
 0x2d2   :  { %v1099_v37 = vadd.f32 %v1085_v28, %v990_v35  ;;  %v1101_v39 = vadd.f32 %v1093_v29, %v1043_v36  ;;  %v992_v40 = vpop.f32.mrb[6].mxu0  ;;  %v1045_v41 = vpop.f32.mrb[6].mxu1 }
 0x2d3   :  { %v2502_v42 = vmul.f32 0.5, %v1098_v32  ;;  %v2504_v43 = vmul.f32 0.5, %v1100_v33  ;;  %v1102_v44 = vadd.f32 %v1081_v26, %v992_v40  ;;  %v1104_v45 = vadd.f32 %v1089_v27, %v1045_v41  ;;  %v994_v46 = vpop.f32.mrb[7].mxu0  ;;  %v1047_v47 = vpop.f32.mrb[7].mxu1 }
 0x2d4   :  { %v2506_v48 = vmul.f32 0.5, %v1099_v37  ;;  %v2508_v49 = vmul.f32 0.5, %v1101_v39  ;;  %v1103_v34 = vadd.f32 %v1085_v28, %v994_v46  ;;  %v1105_v50 = vadd.f32 %v1093_v29, %v1047_v47 }
 0x2d5   :  { %2069 = vtanh.f32 %v2502_v42  ;;  %v1118_v51 = vmul.f32 0.5, %v1102_v44  ;;  %v1120_v52 = vmul.f32 0.5, %v1104_v45 }
 0x2d6   :  { %2071 = vtanh.f32 %v2504_v43  ;;  %v2513_v53 = vmul.f32 0.5, %v1103_v34  ;;  %v2516_v54 = vmul.f32 0.5, %v1105_v50 }
 0x2d7   :  { %2073 = vtanh.f32 %v2506_v48 }
 0x2d8   :  { %2075 = vtanh.f32 %v2508_v49  ;;  %v998_v55 = vpop.f32.mrb[8].mxu0  ;;  %v1051_v56 = vpop.f32.mrb[8].mxu1 }
 0x2d9   :  { %2077 = vtanh.f32 %v1118_v51  ;;  %v1106_v57 = vadd.f32 %v1081_v26, %v998_v55  ;;  %v1108_v58 = vadd.f32 %v1089_v27, %v1051_v56  ;;  %v1000_v59 = vpop.f32.mrb[9].mxu0  ;;  %v1053_v60 = vpop.f32.mrb[9].mxu1 }
 0x2da   :  { %2079 = vtanh.f32 %v1120_v52  ;;  %v1107_v61 = vadd.f32 %v1085_v28, %v1000_v59  ;;  %v1109_v62 = vadd.f32 %v1093_v29, %v1053_v60  ;;  %v1002_v63 = vpop.f32.mrb[10].mxu0  ;;  %v1055_v3 = vpop.f32.mrb[10].mxu1 }
 0x2db   :  { %2081 = vtanh.f32 %v2513_v53  ;;  %v2519_v4 = vmul.f32 0.5, %v1106_v57  ;;  %v2521_v6 = vmul.f32 0.5, %v1108_v58  ;;  %v1110_v7 = vadd.f32 %v1081_v26, %v1002_v63  ;;  %v1004_v8 = vpop.f32.mrb[11].mxu0  ;;  %v1057_v9 = vpop.f32.mrb[11].mxu1 }
 0x2dc   :  { %2083 = vtanh.f32 %v2516_v54  ;;  %v2524_v10 = vmul.f32 0.5, %v1107_v61  ;;  %v2526_v11 = vmul.f32 0.5, %v1109_v62  ;;  %v1112_v12 = vadd.f32 %v1089_v27, %v1055_v3 }
 0x2dd   :  { %2085 = vtanh.f32 %v2519_v4  ;;  %v1126_v13 = vmul.f32 0.5, %v1110_v7  ;;  %v1111_v0 = vadd.f32 %v1085_v28, %v1004_v8  ;;  %v1113_v14 = vadd.f32 %v1093_v29, %v1057_v9 }
 0x2de   :  { %2087 = vtanh.f32 %v2521_v6  ;;  %v1128_v1 = vmul.f32 0.5, %v1112_v12 }
 0x2df   :  { %v2070_v15 = vpop.eup %2069  ;;  %2089 = vtanh.f32 %v2524_v10  ;;  %v1127_v16 = vmul.f32 0.5, %v1111_v0  ;;  %v1129_v17 = vmul.f32 0.5, %v1113_v14 }
 0x2e0   :  { %v2072_v2 = vpop.eup %2071  ;;  %2091 = vtanh.f32 %v2526_v11  ;;  %v1146_v20 = vadd.f32 1.0, %v2070_v15 }
 0x2e1   :  { %v2074_v18 = vpop.eup %2073  ;;  %2093 = vtanh.f32 %v1126_v13  ;;  %v1148_v21 = vadd.f32 1.0, %v2072_v2  ;;  %v1376_v2 = vld [vmem:[#allocation2 + $0x198] sm:$0xff] }
 0x2e2   :  { %v2076_v19 = vpop.eup %2075  ;;  %2095 = vtanh.f32 %v1128_v1  ;;  %v1147_v23 = vadd.f32 1.0, %v2074_v18  ;;  %v1162_v29 = vmul.f32 %v1146_v20, %v2502_v42  ;;  %v1360_v20 = vld [vmem:[#allocation2 + $0x118] sm:$0xff] }
 0x2e3   :  { %v2078_v5 = vpop.eup %2077  ;;  %2097 = vtanh.f32 %v1127_v16  ;;  %v1149_v26 = vadd.f32 1.0, %v2076_v19  ;;  %v1164_v33 = vmul.f32 %v1148_v21, %v2504_v43  ;;  %v1359_v19 = vld [vmem:[#allocation2 + $0x110] sm:$0xff]  ;;  %v1378_v21 = vld [vmem:[#allocation2 + $0x1a8] sm:$0xff] }
 0x2e4   :  { %v2080_v22 = vpop.eup %2079  ;;  %v1150_v24 = vadd.f32 1.0, %v2078_v5  ;;  %2099 = vtanh.f32 %v1129_v17  ;;  %v1163_v39 = vmul.f32 %v1147_v23, %v2506_v48  ;;  %v1377_v5 = vld [vmem:[#allocation2 + $0x1a0] sm:$0xff] }
 0x2e5   :  { %v2082_v25 = vpop.eup %2081  ;;  %v1152_v27 = vadd.f32 1.0, %v2080_v22  ;;  %v1165_v45 = vmul.f32 %v1149_v26, %v2508_v49  ;;  %v1888_v22 = vpack.c.bf16 %v1360_v20, %v1359_v19  ;;  %v1361_v23 = vld [vmem:[#allocation2 + $0x120] sm:$0xff]  ;;  %v1380_v26 = vld [vmem:[#allocation2 + $0x1b8] sm:$0xff] }
 0x2e6   :  { %v2084_v28 = vpop.eup %2083  ;;  %v1166_v30 = vmul.f32 %v1150_v24, %v1118_v51  ;;  %v1151_v31 = vadd.f32 1.0, %v2082_v25  ;;  %v1362_v24 = vld [vmem:[#allocation2 + $0x128] sm:$0xff]  ;;  %v1379_v25 = vld [vmem:[#allocation2 + $0x1b0] sm:$0xff] }
 0x2e7   :  { %v2086_v32 = vpop.eup %2085  ;;  %v1168_v35 = vmul.f32 %v1152_v27, %v1120_v52  ;;  %v1153_v36 = vadd.f32 1.0, %v2084_v28  ;;  %v1892_v27 = vpack.c.bf16 %v1362_v24, %v1361_v23  ;;  %v1894_v28 = vpack.c.bf16 %v1380_v26, %v1379_v25 }
 0x2e8   :  { %v2088_v37 = vpop.eup %2087  ;;  %v1836_v40 = vpack.c.bf16 %v1166_v30, %v1162_v29  ;;  %v1167_v41 = vmul.f32 %v1151_v31, %v2513_v53  ;;  %v1154_v34 = vadd.f32 1.0, %v2086_v32  ;;  %v1363_v29 = vld [vmem:[#allocation2 + $0x130] sm:$0xff]  ;;  %v1364_v30 = vld [vmem:[#allocation2 + $0x138] sm:$0xff]  ;;  %v1381_v31 = vld [vmem:[#allocation2 + $0x1c0] sm:$0xff] }
 0x2e9   :  { %v2090_v44 = vpop.eup %2089  ;;  %v1844_v46 = vpack.c.bf16 %v1168_v35, %v1164_v33  ;;  %v1169_v47 = vmul.f32 %v1153_v36, %v2516_v54  ;;  %v1156_v55 = vadd.f32 1.0, %v2088_v37  ;;  %v1382_v32 = vld [vmem:[#allocation2 + $0x1c8] sm:$0xff]  ;;  %v1896_v33 = vpack.c.bf16 %v1364_v30, %v1363_v29  ;;  %v1365_v36 = vld [vmem:[#allocation2 + $0x140] sm:$0xff] }
 0x2ea   :  { %v2092_v42 = vpop.eup %2091  ;;  %v1834_v50 = vpack.c.bf16 %v1167_v41, %v1163_v39  ;;  %v1155_v56 = vadd.f32 1.0, %v2090_v44  ;;  %v1170_v49 = vmul.f32 %v1154_v34, %v2519_v4  ;;  %v1178_v4 = vld [vmem:[%s2558_s4] sm:$0xff]  ;;  %v1898_v35 = vpack.c.bf16 %v1382_v32, %v1381_v31  ;;  %v1366_v37 = vld [vmem:[#allocation2 + $0x148] sm:$0xff]  ;;  %v1383_v39 = vld [vmem:[#allocation2 + $0x1d0] sm:$0xff] }
 0x2eb   :  { %v2094_v51 = vpop.eup %2093  ;;  %v1842_v43 = vpack.c.bf16 %v1169_v47, %v1165_v45  ;;  %v1157_v58 = vadd.f32 1.0, %v2092_v42  ;;  %v1172_v54 = vmul.f32 %v1156_v55, %v2521_v6  ;;  %v1373_v6 = vld [vmem:[#allocation2 + $0x180] sm:$0xff]  ;;  %v1900_v41 = vpack.c.bf16 %v1366_v37, %v1365_v36  ;;  %v1367_v45 = vld [vmem:[#allocation2 + $0x150] sm:$0xff]  ;;  %v1340_v34 = vld [vmem:[#allocation2 + $0x78] sm:$0xff] }
 0x2ec   :  { %v2096_v52 = vpop.eup %2095  ;;  %v1158_v57 = vadd.f32 1.0, %v2094_v51  ;;  %1835 = vmatprep.subr.bf16.mxu1 %v1834_v50  ;;  %v1171_v3 = vmul.f32 %v1155_v56, %v2524_v10  ;;  %v1339_v42 = vld [vmem:[#allocation2 + $0x70] sm:$0xff]  ;;  %v1385_v51 = vld [vmem:[#allocation2 + $0x1e0] sm:$0xff]  ;;  %v1386_v55 = vld [vmem:[#allocation2 + $0x1e8] sm:$0xff] }
 0x2ed   :  { %v2098_v48 = vpop.eup %2097  ;;  %v1160_v59 = vadd.f32 1.0, %v2096_v52  ;;  %1837 = vmatpush1.bf16.msra.mxu1 %v1836_v40  ;;  %v1173_v9 = vmul.f32 %v1157_v58, %v2526_v11  ;;  %v1357_v11 = vld [vmem:[#allocation2 + $0x100] sm:$0xff]  ;;  %v1384_v40 = vld [vmem:[#allocation2 + $0x1d8] sm:$0xff]  ;;  %v1880_v50 = vpack.c.bf16 %v1340_v34, %v1339_v42  ;;  %v1370_v56 = vld [vmem:[#allocation2 + $0x168] sm:$0xff] }
 0x2ee   :  { %v2100_v53 = vpop.eup %2099  ;;  %v1174_v60 = vmul.f32 %v1158_v57, %v1126_v13  ;;  %v1159_v61 = vadd.f32 1.0, %v2098_v48  ;;  %v1374_v13 = vld [vmem:[#allocation2 + $0x188] sm:$0xff]  ;;  %v1902_v44 = vpack.c.bf16 %v1384_v40, %v1383_v39  ;;  %v1369_v52 = vld [vmem:[#allocation2 + $0x160] sm:$0xff]  ;;  %v1387_v48 = vld [vmem:[#allocation2 + $0x1f0] sm:$0xff] }
 0x2ef   :  { %v1176_v62 = vmul.f32 %v1160_v59, %v1128_v1  ;;  %v1161_v63 = vadd.f32 1.0, %v2100_v53  ;;  %v1882_v10 = vpack.c.bf16 %v1374_v13, %v1373_v6  ;;  %v1358_v1 = vld [vmem:[#allocation2 + $0x108] sm:$0xff]  ;;  %1881 = vmatpush3.bf16.msra.mxu0 %v1880_v50  ;;  %v1908_v57 = vpack.c.bf16 %v1370_v56, %v1369_v52  ;;  %v1388_v58 = vld [vmem:[#allocation2 + $0x1f8] sm:$0xff]  ;;  %v1371_v53 = vld [vmem:[#allocation2 + $0x170] sm:$0xff] }
 0x2f0   :  { %v1840_v7 = vpack.c.bf16 %v1174_v60, %v1170_v49  ;;  %v1175_v8 = vmul.f32 %v1159_v61, %v1127_v16  ;;  %v1375_v16 = vld [vmem:[#allocation2 + $0x190] sm:$0xff]  ;;  %v1910_v59 = vpack.c.bf16 %v1388_v58, %v1387_v48  ;;  %v1372_v49 = vld [vmem:[#allocation2 + $0x178] sm:$0xff] }
 0x2f1   :  { %v1848_v12 = vpack.c.bf16 %v1176_v62, %v1172_v54  ;;  %v1177_v0 = vmul.f32 %v1161_v63, %v1129_v17  ;;  %v1884_v17 = vpack.c.bf16 %v1358_v1, %v1357_v11  ;;  %v1886_v18 = vpack.c.bf16 %v1376_v2, %v1375_v16 }
 0x2f2   :  { %v1838_v14 = vpack.c.bf16 %v1175_v8, %v1171_v3  ;;  %v1912_v60 = vpack.c.bf16 %v1372_v49, %v1371_v53 }
 0x2f3   :  { %v1846_v15 = vpack.c.bf16 %v1177_v0, %v1173_v9  ;;  %v1709_v9 = vld [vmem:[%s2560_s6] ss:$0 sm:$0xff] }
 0x2f4   :  { %1839 = vmatprep.subr.bf16.mxu1 %v1838_v14 }
 0x2f5   :  { %1841 = vmatpush1.bf16.msra.mxu1 %v1840_v7 }
 0x2f6   :  { %1843 = vmatprep.subr.bf16.mxu1 %v1842_v43  ;;  %v1906_v43 = vpack.c.bf16 %v1386_v55, %v1385_v51 }
 0x2f8   :  { %1707 = vmatmul.mubr.msk.f32.vlgmr.msra.gmra.mrb[12].mxu1 %vm1179_vm2, %v1178_v4 }
 0x2f9   :  { %1845 = vmatpush1.bf16.msra.mxu1 %v1844_v46  ;;  %1318 = vmatprep.mubr.f32.mxu1 %v2133_v38  ;;  %v1890_v38 = vpack.c.bf16 %v1378_v21, %v1377_v5  ;;  %v1368_v46 = vld [vmem:[#allocation2 + $0x158] sm:$0xff] }
 0x2fa   :  { %1847 = vmatprep.subr.bf16.mxu1 %v1846_v15  ;;  %v1904_v47 = vpack.c.bf16 %v1368_v46, %v1367_v45 }
 0x2fd   :  { %1849 = vmatpush1.bf16.msra.mxu1 %v1848_v12 }
 0x2fe   :  { %1883 = vmatprep.subr.bf16.mxu1 %v1882_v10 }
 0x300   :  { %1708 = vmatmul.mubr.msk.f32.vlgmr.msra.gmra.mrb[14].mxu1 %vm1179_vm2, %v1178_v4 }
 0x301   :  { %1885 = vmatpush3.bf16.msra.mxu1 %v1884_v17 }
 0x302   :  { %1887 = vmatprep.subr.bf16.mxu1 %v1886_v18 }
 0x305   :  { %1889 = vmatpush3.bf16.msra.mxu1 %v1888_v22 }
 0x306   :  { %1891 = vmatprep.subr.bf16.mxu1 %v1890_v38 }
 0x309   :  { %1893 = vmatpush3.bf16.msra.mxu1 %v1892_v27 }
 0x30a   :  { %1895 = vmatprep.subr.bf16.mxu1 %v1894_v28 }
 0x30d   :  { %1897 = vmatpush3.bf16.msra.mxu1 %v1896_v33 }
 0x30e   :  { %1899 = vmatprep.subr.bf16.mxu1 %v1898_v35 }
 0x311   :  { %1901 = vmatpush3.bf16.msra.mxu1 %v1900_v41 }
 0x312   :  { %1903 = vmatprep.subr.bf16.mxu1 %v1902_v44 }
 0x315   :  { %1905 = vmatpush3.bf16.msra.mxu1 %v1904_v47 }
 0x316   :  { %1907 = vmatprep.subr.bf16.mxu1 %v1906_v43 }
 0x319   :  { %1909 = vmatpush3.bf16.msra.mxu1 %v1908_v57 }
 0x31a   :  { %1911 = vmatprep.subr.bf16.mxu1 %v1910_v59 }
 0x31d   :  { %1913 = vmatpush3.bf16.msra.mxu1 %v1912_v60 }
 0x3cb   :  { %v1249_v61 = vpop.f32.mrb[12].mxu1 }
 0x3cc   :  { %v1251_v54 = vpop.f32.mrb[13].mxu1 }
 0x3cd   :  { %1460 = vmatprep.mubr.f32.mxu0 %v1251_v54 }
 0x3ce   :  { %1461 = vmatmul.mubr.f32.vlgmr.msra.gmra.mrb[16].mxu0 %v1249_v61 }
 0x3d3   :  { %v1320_v62 = vpop.f32.mrb[14].mxu1 }
 0x3d4   :  { %v1322_v63 = vpop.f32.mrb[15].mxu1 }
 0x3d5   :  { %1530 = vmatprep.mubr.f32.mxu1 %v1322_v63 }
 0x3d6   :  { %1531 = vmatmul.mubr.f32.vlgmr.msra.gmra.mrb[16].mxu1 %v1320_v62 }
 0x4a1   :  { %v1760_v3 = vpop.f32.mrb[16].mxu0 }
 0x4a2   :  { %v1761_v7 = vpop.f32.mrb[17].mxu0 }
 0x4a3   :  { %v1762_v8 = vadd.f32 %v1761_v7, %v1760_v3 }
 0x4a5   :  { %v1463_v14 = vadd.f32 %v1762_v8, %v1709_v9 }
 0x4a9   :  { %v1795_v12 = vpop.f32.mrb[16].mxu1 }
 0x4aa   :  { %v1796_v0 = vpop.f32.mrb[17].mxu1 }
 0x4ab   :  { %v1797_v15 = vadd.f32 %v1796_v0, %v1795_v12 }
 0x4ad   :  { %v1533_v4 = vadd.f32 %v1797_v15, %v1463_v14 }
 0x4af   :  { %1536 = vmax.xlane.f32.xlu0 %v1533_v4 }
 0x53c   :  { %v1537_v6 = vpop.xlane.xlu0 %1536 }
 0x53d   :  { %v1538_v13 = vsub.f32 %v1533_v4, %v1537_v6 }
 0x53f   :  { %v1539_v10 = vmul.f32 1.442695, %v1538_v13 }
 0x541   :  { %2101 = vpow2.f32 %v1539_v10 }
 0x54b   :  { %v2102_v11 = vpop.eup %2101 }
 0x54c   :  { %1541 = vadd.xlane.f32.xlu0 %v2102_v11 }
 0x5d9   :  { %v1542_v1 = vpop.xlane.xlu0 %1541 }
 0x5da   :  { %2103 = vrcp.f32 %v1542_v1 }
 0x5e4   :  { %v2104_v16 = vpop.eup %2103 }
 0x5e5   :  { %v1544_v2 = vmul.f32 %v2104_v16, %v2102_v11 }
 0x5e7   :  { %1545 = vst [vmem:[%s2561_s7] sm:$0xff] %v1544_v2 }
 0x5e8   :  { %1550 = vsyncpa [#allocation3], 1 }

</bundles_post_ra>
